<compile_context>
chip_gen: v7x
topology: tpu7x:2x2x1
jax: 0.10.0
libtpu: 0.0.40
codegen_flags: <defaults>
</compile_context>

<pallas_src>
import math

import jax
import jax.numpy as jnp
from jax.experimental import pallas as pl
from jax.experimental.pallas import tpu as pltpu


def _round_up(x: int, m: int) -> int:
    return ((x + m - 1) // m) * m


def _vmem_capacity_bytes() -> int:
    """Physical VMEM per TensorCore, with a conservative (v7x-sized) fallback."""
    try:
        cap = getattr(pltpu.get_tpu_info(), "vmem_capacity_bytes", None)
        if cap:
            return int(cap)
    except Exception:
        pass
    return 64 * 1024 * 1024


def _make_head_kernel(eps: float, hidden: int, num_chunks: int,
                      mxu_dtype, precision):
    inv_h = 1.0 / float(hidden)
    inv_sqrt2 = 1.0 / math.sqrt(2.0)
    cw = hidden // num_chunks          # chunk width, always a multiple of 128

    def head_kernel(x_ref, wt_ref, p_ref, o_ref, y_ref):
        x = x_ref[...]
        if mxu_dtype is not None:
            x = x.astype(mxu_dtype)
        params = p_ref[...]            # [3, H] f32: bias, gamma, beta
        rows = x.shape[0]

        s1 = jnp.zeros((rows, 1), jnp.float32)
        s2 = jnp.zeros((rows, 1), jnp.float32)

        # Pass 1 (static unrolled): per output-column chunk do matmul + bias +
        # exact (erf) GELU + partial LayerNorm stats.  Chunk k's VPU/EUP work
        # co-issues with chunk k+1's MXU pushes instead of trailing them.
        for c in range(num_chunks):
            lo = c * cw
            w_c = wt_ref[:, lo:lo + cw]
            if mxu_dtype is not None:
                w_c = w_c.astype(mxu_dtype)
            y = jnp.dot(x, w_c, preferred_element_type=jnp.float32,
                        precision=precision)
            y = y + params[0:1, lo:lo + cw]
            y = 0.5 * y * (1.0 + jax.lax.erf(y * inv_sqrt2))
            s1 = s1 + jnp.sum(y, axis=-1, keepdims=True)
            s2 = s2 + jnp.sum(y * y, axis=-1, keepdims=True)
            y_ref[:, lo:lo + cw] = y

        mean = s1 * inv_h
        var = jnp.maximum(s2 * inv_h - mean * mean, 0.0)
        rstd = jax.lax.rsqrt(var + eps)

        # Pass 2: cheap normalize + affine over the stored f32 chunks.
        for c in range(num_chunks):
            lo = c * cw
            y = y_ref[:, lo:lo + cw]
            o_ref[:, lo:lo + cw] = (
                (y - mean) * rstd * params[1:2, lo:lo + cw]
                + params[2:3, lo:lo + cw]
            ).astype(o_ref.dtype)

    return head_kernel


def prepare_head_params(dense_w, dense_b, ln_gamma, ln_beta, *, weight_dtype=None):
    """One-time (weight-load-time) prep: transpose W to [in, out] and fold the
    three small vectors into a single (3, H) f32 operand.  Optionally cast the
    weight (e.g. to bf16) for a smaller / faster MXU feed."""
    wt = dense_w.T
    if weight_dtype is not None:
        wt = wt.astype(weight_dtype)
    params = jnp.stack([dense_b, ln_gamma, ln_beta]).astype(jnp.float32)
    return wt, params


def scmodernbert_prediction_head(hidden_states, wt, params, *, eps: float = 1e-5,
                                 row_tile: int = 1024, matmul_precision=None):
    """hidden_states: [B, S, H]; wt: [H, H] = dense.weight.T (pre-transposed);
    params: [3, H] f32 = stack(dense.bias, ln.gamma, ln.beta)."""
    B, S, H = hidden_states.shape
    N = B * S
    x_dtype = hidden_states.dtype
    itemsize = jnp.dtype(x_dtype).itemsize
    w_bytes = jnp.dtype(wt.dtype).itemsize

    # MXU feed dtype (narrower of the two when they differ); f32 accumulation.
    mxu_dtype = None
    if wt.dtype != x_dtype:
        mxu_dtype = wt.dtype if w_bytes < itemsize else x_dtype

    # Output-column chunking (chunk width stays a multiple of 128 lanes).
    num_chunks = 1
    for cand in (4, 2):
        if H % (cand * 128) == 0:
            num_chunks = cand
            break

    # ---- row-tile selection -------------------------------------------------
    min_rows = {4: 8, 2: 16, 1: 32}.get(itemsize, 8)
    tm = max(min_rows, min(row_tile, _round_up(N, min_rows)))
    tm = _round_up(tm, min_rows)

    def vmem_estimate(t):
        est = 2 * t * H * itemsize       # activation rows in (double-buffered)
        est += 2 * t * H * itemsize      # output rows (double-buffered)
        est += H * H * w_bytes           # resident weight, Buffered(1)
        est += 3 * H * 4                 # bias/gamma/beta, Buffered(1)
        est += t * H * 4                 # f32 post-GELU scratch
        est += 2 * t * H * 4             # f32 intermediates headroom
        return est

    vmem_cap = _vmem_capacity_bytes()
    vmem_budget = max(8 << 20, int(0.45 * vmem_cap))
    while tm > min_rows and vmem_estimate(tm) > vmem_budget:
        tm = max(min_rows, _round_up(tm // 2, min_rows))

    # Prefer >=2 grid steps so the "parallel" axis can shard across the two
    # TensorCores on v7x parts (negligible extra cost on 1-TC v5e/v6e).
    if N > min_rows and pl.cdiv(N, tm) < 2:
        tm = max(min_rows, _round_up(pl.cdiv(N, 2), min_rows))

    grid = pl.cdiv(N, tm)   # ragged last block is masked by Pallas (no host pad)

    x2d = hidden_states.reshape(N, H)

    cost = pl.CostEstimate(
        flops=2 * N * H * H + 12 * N * H,
        transcendentals=N * H,
        bytes_accessed=(N * H * itemsize      # activations in
                        + H * H * w_bytes     # weight
                        + 3 * H * 4           # bias/gamma/beta
                        + N * H * itemsize),  # output
    )

    vmem_limit = int(min(int(0.85 * vmem_cap),
                         max(32 << 20,
                             _round_up(vmem_estimate(tm), 1 << 20) + (4 << 20))))

    out2d = pl.pallas_call(
        _make_head_kernel(eps, H, num_chunks, mxu_dtype, matmul_precision),
        out_shape=jax.ShapeDtypeStruct((N, H), x_dtype),
        grid_spec=pltpu.PrefetchScalarGridSpec(
            num_scalar_prefetch=0,
            grid=(grid,),
            in_specs=[
                pl.BlockSpec((tm, H), lambda i: (i, 0)),            # activations
                pl.BlockSpec((H, H), lambda i: (0, 0),
                             pipeline_mode=pl.Buffered(1)),          # W^T (invariant)
                pl.BlockSpec((3, H), lambda i: (0, 0),
                             pipeline_mode=pl.Buffered(1)),          # bias/gamma/beta
            ],
            out_specs=pl.BlockSpec((tm, H), lambda i: (i, 0)),
            scratch_shapes=[pltpu.VMEM((tm, H), jnp.float32)],        # post-GELU y
        ),
        compiler_params=pltpu.CompilerParams(
            dimension_semantics=("parallel",),
            vmem_limit_bytes=vmem_limit,
        ),
        cost_estimate=cost,
    )(x2d, wt, params)

    return out2d.reshape(B, S, H)


def _reference(hidden_states, dense_w, dense_b, ln_gamma, ln_beta, eps):
    y = jnp.einsum("bsh,oh->bso", hidden_states.astype(jnp.float32),
                   dense_w.astype(jnp.float32),
                   precision=jax.lax.Precision.HIGHEST) + dense_b
    y = 0.5 * y * (1.0 + jax.lax.erf(y / jnp.sqrt(2.0)))
    mean = jnp.mean(y, axis=-1, keepdims=True)
    var = jnp.mean((y - mean) ** 2, axis=-1, keepdims=True)
    yn = (y - mean) * jax.lax.rsqrt(var + eps)
    return yn * ln_gamma + ln_beta


if __name__ == "__main__":
    # Small config: batch=2, seq=8, hidden=128 (full hidden dim in one lane block).
    B, S, H = 2, 8, 128
    eps = 1e-5

    key = jax.random.PRNGKey(0)
    k_x, k_w, k_b, k_g, k_be = jax.random.split(key, 5)

    hidden_states = jax.random.normal(k_x, (B, S, H), dtype=jnp.float32)
    # Deterministic synthetic parameters (not loaded from a checkpoint).
    dense_w = jax.random.normal(k_w, (H, H), dtype=jnp.float32) * (1.0 / math.sqrt(H))
    dense_b = jax.random.normal(k_b, (H,), dtype=jnp.float32) * 0.02
    ln_gamma = 1.0 + 0.02 * jax.random.normal(k_g, (H,), dtype=jnp.float32)
    ln_beta = 0.02 * jax.random.normal(k_be, (H,), dtype=jnp.float32)

    # One-time (load-time) prep: transpose + fold small vectors; NOT per call.
    wt, params = prepare_head_params(dense_w, dense_b, ln_gamma, ln_beta)

    out = scmodernbert_prediction_head(
        hidden_states, wt, params, eps=eps,
        matmul_precision=jax.lax.Precision.HIGHEST)
    out = jax.block_until_ready(out)

    ref = _reference(hidden_states, dense_w, dense_b, ln_gamma, ln_beta, eps)
    assert out.shape == (B, S, H)
    assert bool(jnp.all(jnp.isfinite(out)))
    assert jnp.allclose(out, ref, atol=1e-2, rtol=1e-2), "mismatch vs reference"

    print("KERNEL_OK")
</pallas_src>

<mosaic_0001>
module attributes {stable_mosaic.version = 11 : i64} {
  func.func @head_kernel(%arg0: i32, %arg1: memref<8x128xf32, #tpu.memory_space<vmem>>, %arg2: memref<128x128xf32, #tpu.memory_space<vmem>>, %arg3: memref<3x128xf32, #tpu.memory_space<vmem>>, %arg4: memref<8x128xf32, #tpu.memory_space<vmem>>, %arg5: memref<8x128xf32, #tpu.memory_space<vmem>>) attributes {dimension_semantics = [#tpu.dimension_semantics<parallel>], iteration_bounds = array<i64: 2>, scalar_prefetch = 0 : i64, scratch_operands = 1 : i64, tpu.core_type = #tpu.core_type<tc>, window_params = [{transform_indices = @transform_0, window_bounds = array<i64: 8, 128>}, {pipeline_mode = #tpu.pipeline_mode<synchronous>, transform_indices = @transform_1, window_bounds = array<i64: 128, 128>}, {pipeline_mode = #tpu.pipeline_mode<synchronous>, transform_indices = @transform_2, window_bounds = array<i64: 3, 128>}, {transform_indices = @transform_3, window_bounds = array<i64: 8, 128>}]} {
    %c0 = arith.constant 0 : index
    %c0_0 = arith.constant 0 : index
    %0 = vector.load %arg1[%c0, %c0_0] : memref<8x128xf32, #tpu.memory_space<vmem>>, vector<8x128xf32>
    %c0_1 = arith.constant 0 : index
    %c0_2 = arith.constant 0 : index
    %1 = vector.load %arg3[%c0_1, %c0_2] : memref<3x128xf32, #tpu.memory_space<vmem>>, vector<3x128xf32>
    %cst = arith.constant 0.000000e+00 : f32
    %2 = vector.broadcast %cst : f32 to vector<8x1xf32>
    %cst_3 = arith.constant 0.000000e+00 : f32
    %3 = vector.broadcast %cst_3 : f32 to vector<8x1xf32>
    %c0_4 = arith.constant 0 : index
    %c0_5 = arith.constant 0 : index
    %4 = vector.load %arg2[%c0_4, %c0_5] : memref<128x128xf32, #tpu.memory_space<vmem>>, vector<128x128xf32>
    %cst_6 = arith.constant dense<0.000000e+00> : vector<8x128xf32>
    %5 = tpu.matmul %0, %4, %cst_6 {dimension_numbers = #tpu.dot_dimension_numbers<[1], [0], [0], [1], [0, 0, 1, 1], [], []>, precision = #tpu.contract_precision<fp32>} : vector<8x128xf32>, vector<128x128xf32>, vector<8x128xf32> -> vector<8x128xf32>
    %6 = vector.extract_strided_slice %1 {offsets = [0, 0], sizes = [1, 128], strides = [1, 1]} : vector<3x128xf32> to vector<1x128xf32>
    %7 = vector.broadcast %6 : vector<1x128xf32> to vector<8x128xf32>
    %8 = arith.addf %5, %7 : vector<8x128xf32>
    %cst_7 = arith.constant 5.000000e-01 : f32
    %9 = vector.broadcast %cst_7 : f32 to vector<8x128xf32>
    %10 = arith.mulf %9, %8 : vector<8x128xf32>
    %cst_8 = arith.constant 0.707106769 : f32
    %11 = vector.broadcast %cst_8 : f32 to vector<8x128xf32>
    %12 = arith.mulf %8, %11 : vector<8x128xf32>
    %13 = math.erf %12 : vector<8x128xf32>
    %cst_9 = arith.constant 1.000000e+00 : f32
    %14 = vector.broadcast %cst_9 : f32 to vector<8x128xf32>
    %15 = arith.addf %14, %13 : vector<8x128xf32>
    %16 = arith.mulf %10, %15 : vector<8x128xf32>
    %cst_10 = arith.constant dense<0.000000e+00> : vector<8xf32>
    %17 = vector.multi_reduction <add>, %16, %cst_10 [1] : vector<8x128xf32> to vector<8xf32>
    %18 = vector.shape_cast %17 : vector<8xf32> to vector<8x1xf32>
    %19 = arith.addf %2, %18 : vector<8x1xf32>
    %20 = arith.mulf %16, %16 : vector<8x128xf32>
    %cst_11 = arith.constant dense<0.000000e+00> : vector<8xf32>
    %21 = vector.multi_reduction <add>, %20, %cst_11 [1] : vector<8x128xf32> to vector<8xf32>
    %22 = vector.shape_cast %21 : vector<8xf32> to vector<8x1xf32>
    %23 = arith.addf %3, %22 : vector<8x1xf32>
    %c0_12 = arith.constant 0 : index
    %c0_13 = arith.constant 0 : index
    %24 = vector.load %arg5[%c0_12, %c0_13] : memref<8x128xf32, #tpu.memory_space<vmem>>, vector<8x128xf32>
    tpu.vector_store %arg5[%c0_12, %c0_13], %16 {strides = array<i32>} : memref<8x128xf32, #tpu.memory_space<vmem>>, vector<8x128xf32>,
    %cst_14 = arith.constant 7.812500e-03 : f32
    %25 = vector.broadcast %cst_14 : f32 to vector<8x1xf32>
    %26 = arith.mulf %19, %25 : vector<8x1xf32>
    %cst_15 = arith.constant 7.812500e-03 : f32
    %27 = vector.broadcast %cst_15 : f32 to vector<8x1xf32>
    %28 = arith.mulf %23, %27 : vector<8x1xf32>
    %29 = arith.mulf %26, %26 : vector<8x1xf32>
    %30 = arith.subf %28, %29 : vector<8x1xf32>
    %cst_16 = arith.constant 0.000000e+00 : f32
    %31 = vector.broadcast %cst_16 : f32 to vector<8x1xf32>
    %32 = arith.maximumf %30, %31 : vector<8x1xf32>
    %cst_17 = arith.constant 9.99999974E-6 : f32
    %33 = vector.broadcast %cst_17 : f32 to vector<8x1xf32>
    %34 = arith.addf %32, %33 : vector<8x1xf32>
    %35 = math.rsqrt %34 : vector<8x1xf32>
    %c0_18 = arith.constant 0 : index
    %c0_19 = arith.constant 0 : index
    %36 = vector.load %arg5[%c0_18, %c0_19] : memref<8x128xf32, #tpu.memory_space<vmem>>, vector<8x128xf32>
    %37 = vector.broadcast %26 : vector<8x1xf32> to vector<8x128xf32>
    %38 = arith.subf %36, %37 : vector<8x128xf32>
    %39 = vector.broadcast %35 : vector<8x1xf32> to vector<8x128xf32>
    %40 = arith.mulf %38, %39 : vector<8x128xf32>
    %41 = vector.extract_strided_slice %1 {offsets = [1, 0], sizes = [1, 128], strides = [1, 1]} : vector<3x128xf32> to vector<1x128xf32>
    %42 = vector.broadcast %41 : vector<1x128xf32> to vector<8x128xf32>
    %43 = arith.mulf %40, %42 : vector<8x128xf32>
    %44 = vector.extract_strided_slice %1 {offsets = [2, 0], sizes = [1, 128], strides = [1, 1]} : vector<3x128xf32> to vector<1x128xf32>
    %45 = vector.broadcast %44 : vector<1x128xf32> to vector<8x128xf32>
    %46 = arith.addf %43, %45 : vector<8x128xf32>
    %c0_20 = arith.constant 0 : index
    %c0_21 = arith.constant 0 : index
    %47 = vector.load %arg4[%c0_20, %c0_21] : memref<8x128xf32, #tpu.memory_space<vmem>>, vector<8x128xf32>
    tpu.vector_store %arg4[%c0_20, %c0_21], %46 {strides = array<i32>} : memref<8x128xf32, #tpu.memory_space<vmem>>, vector<8x128xf32>,
    return
  }
  func.func @transform_0(%arg0: i32) -> (i32, i32) {
    %c0_i32 = arith.constant 0 : i32
    %c0_i32_0 = arith.constant 0 : i32
    return %arg0, %c0_i32 : i32, i32
  }
  func.func @transform_1(%arg0: i32) -> (i32, i32) {
    %c0_i32 = arith.constant 0 : i32
    %c0_i32_0 = arith.constant 0 : i32
    %c0_i32_1 = arith.constant 0 : i32
    return %c0_i32, %c0_i32_0 : i32, i32
  }
  func.func @transform_2(%arg0: i32) -> (i32, i32) {
    %c0_i32 = arith.constant 0 : i32
    %c0_i32_0 = arith.constant 0 : i32
    %c0_i32_1 = arith.constant 0 : i32
    return %c0_i32, %c0_i32_0 : i32, i32
  }
  func.func @transform_3(%arg0: i32) -> (i32, i32) {
    %c0_i32 = arith.constant 0 : i32
    %c0_i32_0 = arith.constant 0 : i32
    return %arg0, %c0_i32 : i32, i32
  }
}

</mosaic_0001>

<bundles_post_ra>
// kernel: tpu_custom_call.1
= control target key start
LH: loop header
LB: loop body
LE: loop exit
PB: predicated region body
PF: predicated region fallthrough
CT: control target
= control target key end

     0   :  { %8 = vsyncpa [#allocation4], 0  ;;  %s2149_s0 = inlined_call_operand.hbm [shape: f32[16,128], index: 0, kind: input, shape index: {}]   ;;  %s2150_s1 = inlined_call_operand.hbm [shape: f32[128,128], index: 1, kind: input, shape index: {}]   ;;  %s2151_s2 = inlined_call_operand.vmem [shape: f32[3,128], index: 2, kind: input, shape index: {}]   ;;  %s2152_s3 = inlined_call_operand.hbm [shape: f32[16,128], index: 3, kind: output, shape index: {}]  }
   0x1   :  { %10 = vsyncpa [#allocation4 + $0x1], 0 }
   0x2   :  { %11 = vsyncpa [#allocation7], 0 }
   0x3   :  { %12 = vsyncpa [#allocation5], 0 }
   0x4   :  { %14 = vsyncpa [#allocation5 + $0x1], 0  ;;  %s1696_s12 = smov 0   ;;  %s1698_s13 = smov 0  }
   0x5   :  { %s1700_s14 = smov 0   ;;  %s1702_s15 = smov 0  }
   0x6 LB: > { %s1717_s16 = sadd.s32 4294967295, %s1666_s15   ;;  %s992_s17 = sadd.s32 4294967294, %s1666_s15   ;;  %s1666_s15 = sphi %s1702_s15, %s2172_s15   ;;  %s1662_s14 = sphi %s1700_s14, %s2171_s14   ;;  %s1658_s13 = sphi %s1698_s13, %s2170_s13   ;;  %s1654_s12 = sphi %s1696_s12, %s2169_s12  }
   0x7   : > { %p40_p0 = scmp.ne.s32.totalorder %s1658_s13, %s1654_s12  ;;  %p2153_p1 = scmp.eq.s32.totalorder %s1717_s16, 0 }
   0x8   : > { %p112_p3 = scmp.eq.s32.totalorder %s992_s17, 1  ;;  %p993_p5 = scmp.ge.s32.totalorder %s1666_s15, 1 }
   0x9   : > { %p1726_p4 = por %p2153_p1, %p40_p0  ;;  %p119_p7 = scmp.lt.s32.totalorder %s1666_s15, 3 }
   0xa   : > { %p1731_p6 = por %p112_p3, %p40_p0  ;;  %s1668_s21 = smov [#allocation6]  }
   0xb   : > { %s2156_s18 = scalar_select %p1726_p4, 1, 0 }
   0xc   : > { %s2157_s19 = scalar_select %p1731_p6, 1, 0 }
   0xd   : > { %p1736_p8 = pnand %p993_p5, %p119_p7  ;;  %s131_s22 = sshll.u32 %s1668_s21, 4  ;;  %s1740_s22 = int_to_ptr.vmem [resolvable:$true] %s131_s22 }
   0xe   : > { %s1752_s24 = sadd.s32 1, %s1666_s15   ;;  %s27_s25 = sadd.s32 1, %s1662_s14 }
   0xf   : > { %s2158_s20 = scalar_select %p1736_p8, 1, 0 }
  0x10   : > { %p1480_p9 = pneg %p1736_p8  ;;  %s24_s26 = ssub.s32 %s1666_s15, %s1752_s24 }
  0x11   : > { %s1538_s29 = scalar_lea.hbm %s2150_s1, 2048 }
  0x12   : > { %p1747_p11 = pnand %p1480_p9, %p2153_p1  ;;  %p1539_p12 = scmp.ne.s32.totalorder %s2150_s1, %s1538_s29 }
  0x13   : > { %p1545_p5 = scmp.lt.u32.totalorder %s1538_s29, %s2150_s1 }
  0x14   : > { %p1540_p13 = pneg %p1747_p11 }
  0x16   : > { %p1541_p0 = pnand %p1540_p13, %p1539_p12 }
  0x18   : > { %p1542_p3 = pneg %p1541_p0 }
  0x1a   : > { %p1547_p7 = pnand %p1545_p5, %p1542_p3 }
  0x1c   : > { %1550 = shalt.err (!%p1547_p7)
}
  0x1d   : > { %s1551_s7 = scalar_lea.vmem %s1740_s22, 2048  ;;  %p1559_p2 = scmp.lt.s32.totalorder %s1740_s22, %s1740_s22 }
  0x1e   : > { %p1552_p9 = scmp.ne.s32.totalorder %s1740_s22, %s1551_s7  ;;  %p1560_p6 = scmp.lt.s32.totalorder %s1551_s7, %s1551_s7 }
  0x20   : > { %p1554_p10 = pnand %p1552_p9, %p1540_p13  ;;  %p1561_p4 = por %p1560_p6, %p1559_p2 }
  0x22   : > { %p1555_p1 = pneg %p1554_p10 }
  0x24   : > { %p1562_p8 = pnand %p1561_p4, %p1555_p1 }
  0x26   : > { %1565 = shalt.err (!%p1562_p8)
}
  0x27   : > { %s1669_s8 = smov 128   ;;  %s1670_s9 = smov 8  }
  0x28   : > { %1483 = dma.hbm_to_vmem [thread:$0]  (!%p1747_p11), %s2150_s1, 2048, %s1740_s22, [#allocation7], %s1669_s8, %s1669_s8, %s1670_s9  }
  0x29   : > { %p25_p2 = scmp.eq.s32.totalorder %s24_s26, 0  ;;  %p34_p1 = scmp.ne.s32.totalorder %s1662_s14, %s1658_s13 }
  0x2a   : > { %p35_p4 = scmp.eq.s32.totalorder %s1666_s15, 0  ;;  %p1493_p6 = scmp.lt.s32.totalorder %s1666_s15, 2 }
  0x2b   : > { %s1783_s17 = scalar_select %p25_p2, %s1662_s14, %s27_s25  }
  0x2c   : > { %p36_p8 = por %p35_p4, %p34_p1  ;;  %p2160_p10 = scmp.eq.s32.totalorder %s1717_s16, 1 }
  0x2d   : > { %s148_s27 = sand.u32 1, %s1662_s14   ;;  %s997_s28 = sshll.u32 %s1666_s15, 7 }
  0x2e   : > { %p1787_p12 = por %p2160_p10, %p34_p1  ;;  %s996_s29 = sshll.u32 %s148_s27, 3 }
  0x2f   : > { %s1796_s4 = scalar_lea.hbm %s2149_s0, %s997_s28  ;;  %s152_s22 = scalar_lea.vmem [#allocation3], %s996_s29 }
  0x30   : > { %s159_s25 = sshll.u32 %s152_s22, 4  ;;  %p1798_p11 = pnand %p1493_p6, %p36_p8  ;;  %s1802_s25 = int_to_ptr.vmem [resolvable:$true] %s159_s25 }
  0x31   : > { %s149_s5 = scalar_lea.sflag [#allocation4], %s148_s27  ;;  %s1566_s6 = scalar_lea.hbm %s1796_s4, 128 }
  0x32   : > { %p1567_p13 = scmp.ne.s32.totalorder %s1796_s4, %s1566_s6  ;;  %p1568_p0 = pneg %p1798_p11 }
  0x33   : > { %s1571_s9 = scalar_lea.hbm %s2149_s0, 256  ;;  %p1572_p7 = scmp.lt.u32.totalorder %s1796_s4, %s2149_s0 }
  0x34   : > { %p1569_p3 = pnand %p1568_p0, %p1567_p13  ;;  %p1573_p9 = scmp.lt.u32.totalorder %s1571_s9, %s1566_s6 }
  0x35   : > { %p1575_p1 = scmp.lt.u32.totalorder %s1566_s6, %s1796_s4 }
  0x36   : > { %p1570_p5 = pneg %p1569_p3  ;;  %p1574_p2 = por %p1573_p9, %p1572_p7 }
  0x38   : > { %p1576_p4 = por %p1575_p1, %p1574_p2 }
  0x3a   : > { %p1577_p6 = pnand %p1576_p4, %p1570_p5 }
  0x3c   : > { %1580 = shalt.err (!%p1577_p6)
}
  0x3d   : > { %s1581_s27 = scalar_lea.vmem %s1802_s25, 128  ;;  %s1671_s28 = smov [#allocation3]  }
  0x3e   : > { %p1582_p8 = scmp.ne.s32.totalorder %s1802_s25, %s1581_s27  ;;  %s1586_s29 = sshll.u32 %s1671_s28, 4  ;;  %s1587_s29 = int_to_ptr.vmem [resolvable:$false] %s1586_s29 }
  0x3f   : > { %s1588_s23 = scalar_lea.vmem %s1587_s29, 256  ;;  %p1589_p3 = scmp.lt.s32.totalorder %s1802_s25, %s1587_s29 }
  0x40   : > { %p1584_p10 = pnand %p1582_p8, %p1568_p0  ;;  %p1590_p7 = scmp.lt.s32.totalorder %s1588_s23, %s1581_s27 }
  0x42   : > { %p1585_p13 = pneg %p1584_p10  ;;  %p1591_p9 = por %p1590_p7, %p1589_p3 }
  0x44   : > { %p1592_p2 = pnand %p1591_p9, %p1585_p13 }
  0x46   : > { %1595 = shalt.err (!%p1592_p2)
}
  0x47   : > { %1487 = dma.hbm_to_vmem [thread:$0]  (!%p1798_p11), %s1796_s4, 128, %s1802_s25, %s149_s5  }
  0x48   : > { %p2163_p5 = scmp.ne.s32.totalorder %s2158_s20, 0 }
  0x49   : > { %s1832_s30 = sand.u32 (!%p2163_p5), 1, %s1658_s13   ;;  %p2164_p0 = scmp.ne.s32.totalorder (!%p2163_p5), %s2156_s18, 0 }
  0x4a   : > { %168 = sbr.rel (%p2163_p5) target bundleno = 603 (0x25b), region = 32  ;;  %s999_s22 = sshll.u32 (!%p2163_p5), %s1832_s30, 3 }
  0x4b   : > { %s171_s6 = scalar_lea.sflag (!%p2163_p5), [#allocation4], %s1832_s30  ;;  %s1838_s7 = scalar_lea.vmem (!%p2163_p5), [#allocation3], %s999_s22 }
  0x51   : > { %1641 = dma.done.wait (%p2164_p0), %s171_s6, 128  }
  0x52   : > { %1643 = vsyncadd (%p2164_p0), %s171_s6, 4294967168  ;;  %p2165_p11 = scmp.eq.s32.totalorder %s1717_s16, 0 }
  0x54   : > { %1645 = dma.done.wait (%p2165_p11), [#allocation7], 2048   ;;  %p2166_p1 = pmov %p2165_p11 }
  0x55   : > { %v1672_v0 = vmov 0.0|0.0   ;;  %vm1673_vm0 = vmmov 0   ;;  %v1674_v1 = vmov 0.0   ;;  %v203_v2 = vld [vmem:[#allocation6] sm:$0xff]  ;;  %v204_v3 = vld [vmem:[#allocation6 + $0x8] sm:$0xff]  ;;  %v205_v4 = vld [vmem:[#allocation6 + $0x10] sm:$0xff] }
  0x56   : > { %1647 = vsyncadd (%p2166_p1), [#allocation7], 4294965248  ;;  %1318 = vmatprep.subr.bf16.mxu1 %v1672_v0  ;;  %1390 = vmatprep.subr.bf16.mxu0 %v1672_v0  ;;  %v224_v5 = vand.u32 4294901760, %v203_v2  ;;  %v227_v6 = vand.u32 4294901760, %v204_v3  ;;  %v206_v7 = vld [vmem:[#allocation6 + $0x18] sm:$0xff]  ;;  %v230_v8 = vand.u32 4294901760, %v205_v4 }
  0x57   : > { %1140 = vmatprep.mubr.msk.f32.mxu1 %vm1673_vm0, %v1674_v1  ;;  %1245 = vmatprep.mubr.msk.f32.mxu0 %vm1673_vm0, %v1674_v1  ;;  %v233_v9 = vand.u32 4294901760, %v206_v7  ;;  %v207_v10 = vld [vmem:[#allocation6 + $0x20] sm:$0xff]  ;;  %v208_v11 = vld [vmem:[#allocation6 + $0x28] sm:$0xff]  ;;  %v209_v16 = vld [vmem:[#allocation6 + $0x30] sm:$0xff]  ;;  %s1003_s4 = sshll.u32 %s1717_s16, 7  ;;  %s200_s25 = scalar_lea.vmem [#allocation8], %s999_s22 }
  0x58   : > { %v1854_v12 = vpack.c.bf16 %v227_v6, %v224_v5  ;;  %v236_v14 = vand.u32 4294901760, %v207_v10  ;;  %v239_v15 = vand.u32 4294901760, %v208_v11  ;;  %v210_v17 = vld [vmem:[#allocation6 + $0x38] sm:$0xff]  ;;  %v242_v19 = vand.u32 4294901760, %v209_v16  ;;  %v1868_v21 = vld [vmem:[#allocation6 + $0x40] sm:$0xff]  ;;  %v1870_v22 = vld [vmem:[#allocation6 + $0x48] sm:$0xff]  ;;  %s2105_s9 = scalar_lea.hbm %s2152_s3, %s1003_s4 }
  0x59   : > { %v1858_v13 = vpack.c.bf16 %v233_v9, %v230_v8  ;;  %v245_v20 = vand.u32 4294901760, %v210_v17  ;;  %v248_v24 = vand.u32 4294901760, %v1868_v21  ;;  %v251_v25 = vand.u32 4294901760, %v1870_v22  ;;  %v201_v26 = vld [vmem:[%s1838_s7] sm:$0xff]  ;;  %v1897_v35 = vld [vmem:[#allocation6 + $0x60] sm:$0xff]  ;;  %v1901_v36 = vld [vmem:[#allocation6 + $0x68] sm:$0xff] }
  0x5a   : > { %1320 = vmatpush3.bf16.msra.mxu1 %v1854_v12  ;;  %1392 = vmatpush3.bf16.msra.mxu0 %v1854_v12  ;;  %v1864_v18 = vpack.c.bf16 %v239_v15, %v236_v14  ;;  %v1881_v27 = vld [vmem:[#allocation6 + $0x50] sm:$0xff]  ;;  %v1883_v28 = vld [vmem:[#allocation6 + $0x58] sm:$0xff]  ;;  %v1885_v29 = vsub.f32 %v203_v2, %v224_v5  ;;  %v1887_v30 = vand.u32 4294901760, %v201_v26  ;;  %v1889_v31 = vsub.f32 %v204_v3, %v227_v6  ;;  %s912_s26 = sshll.u32 %s200_s25, 4  ;;  %s899_s10 = scalar_lea.sflag [#allocation5], %s1832_s30  ;;  %s2107_s26 = int_to_ptr.vmem [resolvable:$true] %s912_s26 }
  0x5b   : > { %1321 = vmatprep.subr.bf16.mxu1 %v1672_v0  ;;  %1393 = vmatprep.subr.bf16.mxu0 %v1672_v0  ;;  %v1874_v23 = vpack.c.bf16 %v245_v20, %v242_v19  ;;  %v1893_v32 = vpack.c.bf16 %v251_v25, %v248_v24  ;;  %v254_v33 = vand.u32 4294901760, %v1881_v27  ;;  %v257_v34 = vand.u32 4294901760, %v1883_v28  ;;  %v1920_v43 = vld [vmem:[#allocation6 + $0x70] sm:$0xff]  ;;  %v1922_v44 = vld [vmem:[#allocation6 + $0x78] sm:$0xff]  ;;  %s1596_s11 = scalar_lea.vmem %s2107_s26, 128  ;;  %s1675_s16 = smov [#allocation8]  }
  0x5c   : > { %v1903_v37 = vsub.f32 %v205_v4, %v230_v8  ;;  %v1905_v38 = vsub.f32 %v206_v7, %v233_v9  ;;  %v260_v39 = vand.u32 4294901760, %v1897_v35  ;;  %v1909_v40 = vsub.f32 %v201_v26, %v1887_v30  ;;  %p1597_p4 = scmp.ne.s32.totalorder %s2107_s26, %s1596_s11  ;;  %s1600_s27 = sshll.u32 %s1675_s16, 4  ;;  %s1601_s27 = int_to_ptr.vmem [resolvable:$false] %s1600_s27 }
  0x5d   : > { %v1917_v41 = vpack.c.bf16 %v257_v34, %v254_v33  ;;  %v263_v42 = vand.u32 4294901760, %v1901_v36  ;;  %v317_v45 = vand.u32 4294901760, %v1885_v29  ;;  %v324_v46 = vand.u32 4294901760, %v1889_v31  ;;  %s1602_s28 = scalar_lea.vmem %s1601_s27, 256  ;;  %p1603_p10 = scmp.lt.s32.totalorder %s2107_s26, %s1601_s27 }
  0x5e   : > { %1323 = vmatpush3.bf16.msra.mxu1 %v1858_v13  ;;  %1395 = vmatpush3.bf16.msra.mxu0 %v1858_v13  ;;  %v1928_v47 = vsub.f32 %v207_v10, %v236_v14  ;;  %v1930_v48 = vsub.f32 %v208_v11, %v239_v15  ;;  %v266_v49 = vand.u32 4294901760, %v1920_v43  ;;  %v269_v50 = vand.u32 4294901760, %v1922_v44  ;;  %p1598_p6 = pnand %p1597_p4, %p1787_p12  ;;  %p1604_p13 = scmp.lt.s32.totalorder %s1602_s28, %s1596_s11 }
  0x5f   : > { %1324 = vmatprep.subr.bf16.mxu1 %v1672_v0  ;;  %1396 = vmatprep.subr.bf16.mxu0 %v1672_v0  ;;  %v306_v51 = vand.u32 4294901760, %v1909_v40  ;;  %v331_v52 = vand.u32 4294901760, %v1903_v37  ;;  %v1942_v53 = vpack.c.bf16 %v263_v42, %v260_v39  ;;  %v318_v54 = vsub.f32 %v1885_v29, %v317_v45 }
  0x60   : > { %v325_v55 = vsub.f32 %v1889_v31, %v324_v46  ;;  %v338_v56 = vand.u32 4294901760, %v1905_v38  ;;  %v1949_v57 = vsub.f32 %v209_v16, %v242_v19  ;;  %v1951_v58 = vsub.f32 %v210_v17, %v245_v20  ;;  %p1599_p8 = pneg %p1598_p6  ;;  %p1605_p3 = por %p1604_p13, %p1603_p10 }
  0x61   : > { %v307_v59 = vsub.f32 %v1909_v40, %v306_v51  ;;  %v332_v60 = vsub.f32 %v1903_v37, %v331_v52  ;;  %v345_v61 = vand.u32 4294901760, %v1928_v47  ;;  %v352_v62 = vand.u32 4294901760, %v1930_v48 }
  0x62   : > { %1326 = vmatpush3.bf16.msra.mxu1 %v1864_v18  ;;  %1398 = vmatpush3.bf16.msra.mxu0 %v1864_v18  ;;  %v1963_v63 = vpack.c.bf16 %v269_v50, %v266_v49  ;;  %v319_v2 = vand.u32 4294901760, %v318_v54  ;;  %v326_v3 = vand.u32 4294901760, %v325_v55  ;;  %v339_v4 = vsub.f32 %v1905_v38, %v338_v56  ;;  %p1606_p7 = pnand %p1605_p3, %p1599_p8 }
  0x63   : > { %1327 = vmatprep.subr.bf16.mxu1 %v1672_v0  ;;  %1399 = vmatprep.subr.bf16.mxu0 %v1672_v0  ;;  %v1969_v5 = vsub.f32 %v1868_v21, %v248_v24  ;;  %v1972_v6 = vsub.f32 %v1870_v22, %v251_v25  ;;  %v1415_v7 = vpack.c.bf16 %v324_v46, %v317_v45  ;;  %v308_v8 = vand.u32 4294901760, %v307_v59 }
  0x64   : > { %v333_v9 = vand.u32 4294901760, %v332_v60  ;;  %v346_v10 = vsub.f32 %v1928_v47, %v345_v61  ;;  %v353_v11 = vsub.f32 %v1930_v48, %v352_v62  ;;  %v1343_v14 = vpack.c.bf16 %v326_v3, %v319_v2 }
  0x65   : > { %v340_v15 = vand.u32 4294901760, %v339_v4  ;;  %v359_v16 = vand.u32 4294901760, %v1949_v57  ;;  %v366_v17 = vand.u32 4294901760, %v1951_v58  ;;  %v1985_v19 = vsub.f32 %v1881_v27, %v254_v33 }
  0x66   : > { %1329 = vmatpush3.bf16.msra.mxu1 %v1874_v23  ;;  %1401 = vmatpush3.bf16.msra.mxu0 %v1874_v23  ;;  %v1990_v20 = vsub.f32 %v1883_v28, %v257_v34  ;;  %v1418_v21 = vpack.c.bf16 %v338_v56, %v331_v52  ;;  %v347_v22 = vand.u32 4294901760, %v346_v10  ;;  %v354_v24 = vand.u32 4294901760, %v353_v11 }
  0x67   : > { %1330 = vmatprep.subr.bf16.mxu1 %v1672_v0  ;;  %1402 = vmatprep.subr.bf16.mxu0 %v1672_v0  ;;  %v373_v25 = vand.u32 4294901760, %v1969_v5  ;;  %v1346_v26 = vpack.c.bf16 %v340_v15, %v333_v9  ;;  %v360_v45 = vsub.f32 %v1949_v57, %v359_v16  ;;  %v367_v27 = vsub.f32 %v1951_v58, %v366_v17 }
  0x68   : > { %v380_v33 = vand.u32 4294901760, %v1972_v6  ;;  %v2001_v28 = vsub.f32 %v1897_v35, %v260_v39  ;;  %v2006_v34 = vsub.f32 %v1901_v36, %v263_v42  ;;  %v1349_v46 = vpack.c.bf16 %v354_v24, %v347_v22 }
  0x69   : > { %v374_v52 = vsub.f32 %v1969_v5, %v373_v25  ;;  %v387_v54 = vand.u32 4294901760, %v1985_v19  ;;  %v361_v35 = vand.u32 4294901760, %v360_v45  ;;  %v368_v39 = vand.u32 4294901760, %v367_v27 }
  0x6a   : > { %1332 = vmatpush3.bf16.msra.mxu1 %v1893_v32  ;;  %1404 = vmatpush3.bf16.msra.mxu0 %v1893_v32  ;;  %v381_v55 = vsub.f32 %v1972_v6, %v380_v33  ;;  %v394_v36 = vand.u32 4294901760, %v1990_v20  ;;  %v2021_v42 = vsub.f32 %v1920_v43, %v266_v49  ;;  %v2026_v56 = vsub.f32 %v1922_v44, %v269_v50 }
  0x6b   : > { %1333 = vmatprep.subr.bf16.mxu1 %v1672_v0  ;;  %1405 = vmatprep.subr.bf16.mxu0 %v1672_v0  ;;  %v1424_v59 = vpack.c.bf16 %v366_v17, %v359_v16  ;;  %v375_v60 = vand.u32 4294901760, %v374_v52  ;;  %v1352_v2 = vpack.c.bf16 %v368_v39, %v361_v35  ;;  %v408_v43 = vand.u32 4294901760, %v2006_v34 }
  0x6c   : > { %v382_v3 = vand.u32 4294901760, %v381_v55  ;;  %v395_v4 = vsub.f32 %v1990_v20, %v394_v36  ;;  %v1427_v44 = vpack.c.bf16 %v380_v33, %v373_v25  ;;  %v422_v11 = vand.u32 4294901760, %v2026_v56 }
  0x6d   : > { %v409_v10 = vsub.f32 %v2006_v34, %v408_v43 }
  0x6e   : > { %1335 = vmatpush3.bf16.msra.mxu1 %v1917_v41  ;;  %1407 = vmatpush3.bf16.msra.mxu0 %v1917_v41  ;;  %v396_v9 = vand.u32 4294901760, %v395_v4  ;;  %v423_v22 = vsub.f32 %v2026_v56, %v422_v11 }
  0x6f   : > { %1336 = vmatprep.subr.bf16.mxu1 %v1672_v0  ;;  %1408 = vmatprep.subr.bf16.mxu0 %v1672_v0  ;;  %v410_v17 = vand.u32 4294901760, %v409_v10 }
  0x70   : > { %v424_v45 = vand.u32 4294901760, %v423_v22 }
  0x72   : > { %1338 = vmatpush3.bf16.msra.mxu1 %v1942_v53  ;;  %1410 = vmatpush3.bf16.msra.mxu0 %v1942_v53 }
  0x73   : > { %1339 = vmatprep.subr.bf16.mxu1 %v1672_v0  ;;  %1411 = vmatprep.subr.bf16.mxu0 %v1672_v0 }
  0x76   : > { %1341 = vmatpush3.bf16.msra.mxu1 %v1963_v63  ;;  %1413 = vmatpush3.bf16.msra.mxu0 %v1963_v63 }
  0x77   : > { %1342 = vmatprep.subr.bf16.mxu1 %v1672_v0  ;;  %1414 = vmatprep.subr.bf16.mxu0 %v1672_v0 }
  0x79   : > { %1141 = vmatmul.mubr.f32.vlgmr.msra.gmra.mrb[0].mxu1 %v308_v8  ;;  %1246 = vmatmul.mubr.f32.vlgmr.msra.gmra.mrb[0].mxu0 %v306_v51  ;;  %v1421_v51 = vpack.c.bf16 %v352_v62, %v345_v61  ;;  %v388_v61 = vsub.f32 %v1985_v19, %v387_v54  ;;  %v401_v62 = vand.u32 4294901760, %v2001_v28  ;;  %v1355_v8 = vpack.c.bf16 %v382_v3, %v375_v60 }
  0x7a   : > { %1344 = vmatpush3.bf16.msra.mxu1 %v1343_v14  ;;  %1416 = vmatpush3.bf16.msra.mxu0 %v1415_v7  ;;  %v415_v7 = vand.u32 4294901760, %v2021_v42  ;;  %v1430_v14 = vpack.c.bf16 %v394_v36, %v387_v54 }
  0x7b   : > { %1345 = vmatprep.subr.bf16.mxu1 %v1672_v0  ;;  %1417 = vmatprep.subr.bf16.mxu0 %v1672_v0  ;;  %v389_v49 = vand.u32 4294901760, %v388_v61  ;;  %v402_v50 = vsub.f32 %v2001_v28, %v401_v62  ;;  %v1433_v25 = vpack.c.bf16 %v408_v43, %v401_v62 }
  0x7c   : > { %1175 = vmatprep.mubr.msk.f32.mxu1 %vm1673_vm0, %v1674_v1  ;;  %1280 = vmatprep.mubr.msk.f32.mxu0 %vm1673_vm0, %v1674_v1  ;;  %v1436_v33 = vpack.c.bf16 %v422_v11, %v415_v7 }
  0x7d   : > { %v403_v15 = vand.u32 4294901760, %v402_v50  ;;  %v1358_v16 = vpack.c.bf16 %v396_v9, %v389_v49 }
  0x7e   : > { %1347 = vmatpush3.bf16.msra.mxu1 %v1346_v26  ;;  %1419 = vmatpush3.bf16.msra.mxu0 %v1418_v21  ;;  %v416_v21 = vsub.f32 %v2021_v42, %v415_v7 }
  0x7f   : > { %1348 = vmatprep.subr.bf16.mxu1 %v1672_v0  ;;  %1420 = vmatprep.subr.bf16.mxu0 %v1672_v0  ;;  %v1361_v24 = vpack.c.bf16 %v410_v17, %v403_v15 }
  0x80   : > { %v417_v26 = vand.u32 4294901760, %v416_v21 }
  0x82   : > { %1350 = vmatpush3.bf16.msra.mxu1 %v1349_v46  ;;  %1422 = vmatpush3.bf16.msra.mxu0 %v1421_v51  ;;  %v1364_v27 = vpack.c.bf16 %v424_v45, %v417_v26  ;;  %v1367_v46 = vpack.c.bf16 %v1889_v31, %v1885_v29  ;;  %v1370_v51 = vpack.c.bf16 %v1905_v38, %v1903_v37  ;;  %v219_v31 = vlaneseq  ;;  %v202_v38 = vld [vmem:[%s2151_s2] sm:$0x7] }
  0x83   : > { %1351 = vmatprep.subr.bf16.mxu1 %v1672_v0  ;;  %1423 = vmatprep.subr.bf16.mxu0 %v1672_v0  ;;  %v1373_v29 = vpack.c.bf16 %v1930_v48, %v1928_v47 }
  0x86   : > { %1353 = vmatpush3.bf16.msra.mxu1 %v1352_v2  ;;  %1425 = vmatpush3.bf16.msra.mxu0 %v1424_v59 }
  0x87   : > { %1354 = vmatprep.subr.bf16.mxu1 %v1672_v0  ;;  %1426 = vmatprep.subr.bf16.mxu0 %v1672_v0 }
  0x8a   : > { %1356 = vmatpush3.bf16.msra.mxu1 %v1355_v8  ;;  %1428 = vmatpush3.bf16.msra.mxu0 %v1427_v44 }
  0x8b   : > { %1357 = vmatprep.subr.bf16.mxu1 %v1672_v0  ;;  %1429 = vmatprep.subr.bf16.mxu0 %v1672_v0 }
  0x8e   : > { %1359 = vmatpush3.bf16.msra.mxu1 %v1358_v16  ;;  %1431 = vmatpush3.bf16.msra.mxu0 %v1430_v14 }
  0x8f   : > { %1360 = vmatprep.subr.bf16.mxu1 %v1672_v0  ;;  %1432 = vmatprep.subr.bf16.mxu0 %v1672_v0 }
  0x92   : > { %1362 = vmatpush3.bf16.msra.mxu1 %v1361_v24  ;;  %1434 = vmatpush3.bf16.msra.mxu0 %v1433_v25 }
  0x93   : > { %1363 = vmatprep.subr.bf16.mxu1 %v1672_v0  ;;  %1435 = vmatprep.subr.bf16.mxu0 %v1672_v0 }
  0x96   : > { %1365 = vmatpush3.bf16.msra.mxu1 %v1364_v27  ;;  %1437 = vmatpush3.bf16.msra.mxu0 %v1436_v33 }
  0x97   : > { %1366 = vmatprep.subr.bf16.mxu1 %v1672_v0  ;;  %1438 = vmatprep.subr.bf16.mxu0 %v1672_v0 }
  0x99   : > { %1176 = vmatmul.mubr.f32.vlgmr.msra.gmra.mrb[0].mxu1 %v1887_v30  ;;  %1281 = vmatmul.mubr.f32.vlgmr.msra.gmra.mrb[0].mxu0 %v1887_v30 }
  0x9a   : > { %1368 = vmatpush3.bf16.msra.mxu1 %v1367_v46  ;;  %1440 = vmatpush3.bf16.msra.mxu0 %v1854_v12  ;;  %v1376_v12 = vpack.c.bf16 %v1951_v58, %v1949_v57 }
  0x9b   : > { %1369 = vmatprep.subr.bf16.mxu1 %v1672_v0  ;;  %1441 = vmatprep.subr.bf16.mxu0 %v1672_v0 }
  0x9c   : > { %1210 = vmatprep.mubr.msk.f32.mxu1 %vm1673_vm0, %v1674_v1  ;;  %1315 = vmatprep.mubr.msk.f32.mxu0 %vm1673_vm0, %v1674_v1  ;;  %v1379_v1 = vpack.c.bf16 %v1972_v6, %v1969_v5 }
  0x9e   : > { %1371 = vmatpush3.bf16.msra.mxu1 %v1370_v51  ;;  %1443 = vmatpush3.bf16.msra.mxu0 %v1858_v13  ;;  %v1382_v13 = vpack.c.bf16 %v1990_v20, %v1985_v19 }
  0x9f   : > { %1372 = vmatprep.subr.bf16.mxu1 %v1672_v0  ;;  %1444 = vmatprep.subr.bf16.mxu0 %v1672_v0 }
  0xa2   : > { %1374 = vmatpush3.bf16.msra.mxu1 %v1373_v29  ;;  %1446 = vmatpush3.bf16.msra.mxu0 %v1864_v18  ;;  %v1385_v18 = vpack.c.bf16 %v2006_v34, %v2001_v28 }
  0xa3   : > { %1375 = vmatprep.subr.bf16.mxu1 %v1672_v0  ;;  %1447 = vmatprep.subr.bf16.mxu0 %v1672_v0 }
  0xa6   : > { %1377 = vmatpush3.bf16.msra.mxu1 %v1376_v12  ;;  %1449 = vmatpush3.bf16.msra.mxu0 %v1874_v23  ;;  %v1388_v23 = vpack.c.bf16 %v2026_v56, %v2021_v42 }
  0xa7   : > { %1378 = vmatprep.subr.bf16.mxu1 %v1672_v0  ;;  %1450 = vmatprep.subr.bf16.mxu0 %v1672_v0 }
  0xaa   : > { %1380 = vmatpush3.bf16.msra.mxu1 %v1379_v1  ;;  %1452 = vmatpush3.bf16.msra.mxu0 %v1893_v32  ;;  %v220_v32 = vshrl.u32 %v219_v31, 7 }
  0xab   : > { %1381 = vmatprep.subr.bf16.mxu1 %v1672_v0  ;;  %1453 = vmatprep.subr.bf16.mxu0 %v1672_v0 }
  0xac   : > { %v221_v37 = vsub.s32 0, %v220_v32  ;;  %v889_v36 = vsub.s32 1, %v220_v32  ;;  %v894_v42 = vsub.s32 2, %v220_v32 }
  0xae   : > { %1383 = vmatpush3.bf16.msra.mxu1 %v1382_v13  ;;  %1455 = vmatpush3.bf16.msra.mxu0 %v1917_v41  ;;  %v222_v41 = vrot.slane %v202_v38, %v221_v37  ;;  %v890_v56 = vrot.slane %v202_v38, %v889_v36  ;;  %v895_v61 = vrot.slane %v202_v38, %v894_v42 }
  0xaf   : > { %1384 = vmatprep.subr.bf16.mxu1 %v1672_v0  ;;  %1456 = vmatprep.subr.bf16.mxu0 %v1672_v0 }
  0xb2   : > { %1386 = vmatpush3.bf16.msra.mxu1 %v1385_v18  ;;  %1458 = vmatpush3.bf16.msra.mxu0 %v1942_v53 }
  0xb3   : > { %1387 = vmatprep.subr.bf16.mxu1 %v1672_v0  ;;  %1459 = vmatprep.subr.bf16.mxu0 %v1672_v0 }
  0xb6   : > { %1389 = vmatpush3.bf16.msra.mxu1 %v1388_v23  ;;  %1461 = vmatpush3.bf16.msra.mxu0 %v1963_v63 }
  0xb9   : > { %1211 = vmatmul.mubr.f32.vlgmr.msra.gmra.mrb[0].mxu1 %v1909_v40  ;;  %1316 = vmatmul.mubr.f32.vlgmr.msra.gmra.mrb[0].mxu0 %v1887_v30 }
 0x18c   : > { %v565_v47 = vpop.f32.mrb[0].mxu1  ;;  %v860_v48 = vpop.f32.mrb[0].mxu0 }
 0x18d   : > { %v1462_v53 = vadd.f32 %v565_v47, %v222_v41  ;;  %v1212_v57 = vpop.f32.mrb[1].mxu1  ;;  %v1317_v0 = vpop.f32.mrb[1].mxu0 }
 0x18f   : > { %v1463_v58 = vadd.f32 %v1462_v53, %v860_v48 }
 0x191   : > { %v865_v5 = vmul.f32 0.70710677, %v1463_v58  ;;  %v864_v40 = vmul.f32 0.5, %v1463_v58 }
 0x193   : > { %1534 = verf.f32 %v865_v5 }
 0x19d   : > { %v1535_v63 = vpop.eup %1534 }
 0x19e   : > { %v867_v6 = vadd.f32 1.0, %v1535_v63 }
 0x1a0   : > { %v868_v30 = vmul.f32 %v867_v6, %v864_v40 }
 0x1a2   : > { %869 = vadd.xlane.f32.xlu0 %v868_v30  ;;  %v872_v19 = vmul.f32 %v868_v30, %v868_v30 }
 0x1a6   : > { %873 = vadd.xlane.f32.xlu0 %v872_v19 }
 0x22f   : > { %v870_v20 = vpop.xlane.xlu0 %869 }
 0x230   : > { %v877_v28 = vmul.f32 0.0078125, %v870_v20 }
 0x232   : > { %v879_v52 = vmul.f32 %v877_v28, %v877_v28  ;;  %v885_v59 = vsub.f32 %v868_v30, %v877_v28 }
 0x233   : > { %v874_v34 = vpop.xlane.xlu0 %873 }
 0x234   : > { %v878_v54 = vmul.f32 0.0078125, %v874_v34 }
 0x236   : > { %v880_v35 = vsub.f32 %v878_v54, %v879_v52 }
 0x238   : > { %v881_v39 = vmax.f32 %v880_v35, 0.0 }
 0x23a   : > { %v882_v55 = vadd.f32 1e-05, %v881_v39 }
 0x23c   : > { %1536 = vrsqrt.f32 %v882_v55 }
 0x246   : > { %v1537_v60 = vpop.eup %1536 }
 0x247   : > { %v886_v62 = vmul.f32 %v1537_v60, %v885_v59 }
 0x249   : > { %v891_v2 = vmul.f32 %v890_v56, %v886_v62 }
 0x24b   : > { %v896_v3 = vadd.f32 %v895_v61, %v891_v2 }
 0x24d   : > { %897 = vst [vmem:[%s200_s25] sm:$0xff] %v896_v3 }
 0x24e   : > { %1609 = shalt.err (!%p1606_p7)
}
 0x24f   : > { %s1610_s29 = scalar_lea.hbm %s2105_s9, 128  ;;  %s1614_s22 = scalar_lea.hbm %s2152_s3, 256 }
 0x250   : > { %p1611_p9 = scmp.ne.s32.totalorder %s2105_s9, %s1610_s29  ;;  %p1615_p0 = scmp.lt.u32.totalorder %s2105_s9, %s2152_s3 }
 0x251   : > { %p1616_p11 = scmp.lt.u32.totalorder %s1614_s22, %s1610_s29  ;;  %p1618_p4 = scmp.lt.u32.totalorder %s1610_s29, %s2105_s9 }
 0x252   : > { %p1612_p2 = pnand %p1611_p9, %p1787_p12 }
 0x253   : > { %p1617_p1 = por %p1616_p11, %p1615_p0 }
 0x254   : > { %p1613_p5 = pneg %p1612_p2 }
 0x255   : > { %p1619_p6 = por %p1618_p4, %p1617_p1 }
 0x257   : > { %p1620_p8 = pnand %p1619_p6, %p1613_p5 }
 0x259   : > { %1623 = shalt.err (!%p1620_p8)
}
 0x25a   : > { %1478 = dma.vmem_to_hbm [thread:$0]  (%p1787_p12), %s2107_s26, 128, %s2105_s9, %s899_s10  }
 0x25b PF: > { %s924_s18 = sand.u32 1, %s1654_s12   ;;  %p2167_p10 = scmp.ne.s32.totalorder %s2157_s19, 0 }
 0x25c   : > { %p2168_p13 = scmp.ge.s32.totalorder %s1666_s15, 2  ;;  %s925_s20 = scalar_lea.sflag [#allocation5], %s924_s18 }
 0x25e   : > { %p1489_p3 = pnand %p2168_p13, %p2167_p10 }
 0x260   : > { %1649 = dma.done.wait (!%p1489_p3), %s925_s20, 128  }
 0x261   : > { %1651 = vsyncadd (!%p1489_p3), %s925_s20, 4294967168  ;;  %p17_p7 = scmp.ge.s32.totalorder %s1752_s24, 4   ;;  %s2169_s12 = smov %s1658_s13 }
 0x262   : > { %s2170_s13 = smov %s1662_s14  ;;  %s2171_s14 = smov %s1783_s17 }
 0x263   : > { %s2172_s15 = smov %s1752_s24  ;;  %19 = sbr.rel (!%p17_p7) target bundleno = 6 (0x6), region = 81 }
 0x26a   :  { %930 = vsyncpa [#allocation4], 1 }
 0x26b   :  { %932 = vsyncpa [#allocation4 + $0x1], 1 }
 0x26c   :  { %933 = vsyncpa [#allocation7], 1 }
 0x26d   :  { %934 = vsyncpa [#allocation5], 1 }
 0x26e   :  { %936 = vsyncpa [#allocation5 + $0x1], 1 }

</bundles_post_ra>
